<compile_context>
chip_gen: v7x
topology: tpu7x:2x2x1
jax: 0.10.0
libtpu: 0.0.40
codegen_flags: <defaults>
</compile_context>

<pallas_src>
import functools

import numpy as np
import jax
import jax.numpy as jnp
from jax import lax
from jax.experimental import pallas as pl
from jax.experimental.pallas import tpu as pltpu


def _conv1d_kernel(xe_ref, xo_ref, w_ref, o_ref, *, wout, eps):
    # xe_ref: (1, Cin, S)   even input columns x[..., 2j]   (S = H * Wout)
    # xo_ref: (1, Cin, S)   odd  input columns x[..., 2j+1]
    # w_ref:  (Cout, 4*Cin) stacked conv weight, tap-major along K
    # o_ref:  (1, Cout, S)  instance-normalized output, spatial on the lane axis
    cin, s = xe_ref.shape[1], xe_ref.shape[2]

    # ReLU (VPU).
    xe = jnp.maximum(xe_ref[0], 0.0)            # x[ci, h, 2j]
    xo = jnp.maximum(xo_ref[0], 0.0)            # x[ci, h, 2j+1]

    # Output-column index j inside each H row of the flattened lane axis.
    col = lax.broadcasted_iota(jnp.int32, (cin, s), 1) % wout

    # tap 0 input: x[ci, h, 2j-1] = xo shifted right by one output column
    #   (zero at j == 0; the mask also kills the wrap-around across H rows).
    x_m1 = jnp.where(col == 0, 0.0, pltpu.roll(xo, 1, 1))
    # tap 3 input: x[ci, h, 2j+2] = xe shifted left by one output column
    #   (zero at j == wout-1; roll by s-1 == roll by -1).
    x_p2 = jnp.where(col == wout - 1, 0.0, pltpu.roll(xe, s - 1, 1))

    # Stack taps along the contraction dim: K = 4*Cin, order k = 0, 1, 2, 3.
    xk = jnp.concatenate([x_m1, xe, xo, x_p2], axis=0)       # (4*Cin, S)

    # Single fused MXU matmul, DEFAULT precision, f32 accumulate.
    y = jnp.dot(w_ref[...], xk, preferred_element_type=jnp.float32)  # (Cout, S)

    # InstanceNorm2d(affine=False, eps): per-channel stats over all H*Wout.
    mean = jnp.mean(y, axis=1, keepdims=True)
    d = y - mean
    var = jnp.mean(d * d, axis=1, keepdims=True)
    o_ref[0] = (d * lax.rsqrt(var + eps)).astype(o_ref.dtype)


def conv_1d_forward(x_nchw, weight, bias=None, *, eps=1e-5):
    """Forward pass of conv_1d.

    x_nchw: (B, Cin, H, W) float32   -- PyTorch NCHW input
    weight: (Cout, Cin, 1, 4)        -- nn.Conv2d weight layout
    bias:   (Cout,) or None          -- ignored: exact no-op under InstanceNorm2d
    returns (B, Cout, H, Wout) float32 NCHW, Wout = (W + 2 - 4)//2 + 1.
    """
    del bias  # per-channel constant cancels exactly in InstanceNorm (affine=False)
    B, Cin, H, W = x_nchw.shape
    Cout = weight.shape[0]
    assert W % 2 == 0, "kernel assumes even input width"
    Wout = (W + 2 * 1 - 4) // 2 + 1
    S = H * Wout

    # Stride-2 phase split (the only wrapper-side data movement over x).
    xe = x_nchw[:, :, :, 0:2 * Wout:2].reshape(B, Cin, S)
    xo = x_nchw[:, :, :, 1:2 * Wout:2].reshape(B, Cin, S)

    # (Cout, Cin, 4) -> (Cout, 4, Cin) -> (Cout, 4*Cin), tap-major K blocks.
    wm = jnp.transpose(weight[:, :, 0, :], (0, 2, 1)).reshape(Cout, 4 * Cin)
    wm = wm.astype(jnp.float32)

    kernel = functools.partial(_conv1d_kernel, wout=Wout, eps=eps)
    out_flat = pl.pallas_call(
        kernel,
        out_shape=jax.ShapeDtypeStruct((B, Cout, S), jnp.float32),
        grid_spec=pltpu.PrefetchScalarGridSpec(
            num_scalar_prefetch=0,
            grid=(B,),
            in_specs=[
                pl.BlockSpec((1, Cin, S), lambda b: (b, 0, 0)),
                pl.BlockSpec((1, Cin, S), lambda b: (b, 0, 0)),
                pl.BlockSpec((Cout, 4 * Cin), lambda b: (0, 0)),
            ],
            out_specs=pl.BlockSpec((1, Cout, S), lambda b: (b, 0, 0)),
        ),
        compiler_params=pltpu.CompilerParams(
            dimension_semantics=("parallel",)),
    )(xe, xo, wm)

    return out_flat.reshape(B, Cout, H, Wout)


def _reference_numpy(x, w, b, eps=1e-5):
    """Direct NumPy ReLU -> Conv2d(k=(1,4), s=(1,2), p=(0,1), bias) -> InstanceNorm2d."""
    x = np.asarray(x, np.float32)
    w = np.asarray(w, np.float32)
    b = np.asarray(b, np.float32)
    B, Cin, H, W = x.shape
    Cout = w.shape[0]
    xr = np.maximum(x, 0.0)
    xp = np.pad(xr, ((0, 0), (0, 0), (0, 0), (1, 1)))        # padding=(0,1)
    Wout = (W + 2 - 4) // 2 + 1
    y = np.zeros((B, Cout, H, Wout), np.float32)
    for j in range(Wout):
        win = xp[:, :, :, 2 * j: 2 * j + 4]                  # (B, Cin, H, 4)
        y[:, :, :, j] = np.einsum('bchk,ock->boh', win, w[:, :, 0, :])
    y += b.reshape(1, Cout, 1, 1)
    mean = y.mean(axis=(2, 3), keepdims=True)
    var = y.var(axis=(2, 3), keepdims=True)
    return (y - mean) / np.sqrt(var + eps)


if __name__ == "__main__":
    B, in_ch, out_ch, H, W = 2, 4, 8, 16, 16

    key = jax.random.PRNGKey(0)
    kx, kw, kb = jax.random.split(key, 3)
    x = jax.random.normal(kx, (B, in_ch, H, W), dtype=jnp.float32)
    # nn.Conv2d(in_ch, out_ch, kernel_size=(1, 4)) -> weight (out_ch, in_ch, 1, 4)
    weight = 0.1 * jax.random.normal(kw, (out_ch, in_ch, 1, 4), dtype=jnp.float32)
    bias = 0.1 * jax.random.normal(kb, (out_ch,), dtype=jnp.float32)

    out = jax.jit(conv_1d_forward)(x, weight, bias)
    out = jax.block_until_ready(out)

    Wout = (W + 2 - 4) // 2 + 1
    assert out.shape == (B, out_ch, H, Wout), out.shape

    ref = _reference_numpy(np.asarray(x), np.asarray(weight), np.asarray(bias))
    # Tolerance sized for the single-pass bf16 MXU matmul (DEFAULT precision,
    # per the perf review); contraction depth is only 4*Cin so error stays small.
    np.testing.assert_allclose(np.asarray(out), ref, rtol=2e-2, atol=2e-2)

    print("KERNEL_OK")
</pallas_src>

<mosaic_0001>
module attributes {stable_mosaic.version = 11 : i64} {
  func.func @_conv1d_kernel(%arg0: i32, %arg1: memref<1x4x128xf32, #tpu.memory_space<vmem>>, %arg2: memref<1x4x128xf32, #tpu.memory_space<vmem>>, %arg3: memref<8x16xf32, #tpu.memory_space<vmem>>, %arg4: memref<1x8x128xf32, #tpu.memory_space<vmem>>) attributes {dimension_semantics = [#tpu.dimension_semantics<parallel>], iteration_bounds = array<i64: 2>, scalar_prefetch = 0 : i64, scratch_operands = 0 : i64, tpu.core_type = #tpu.core_type<tc>, window_params = [{transform_indices = @transform_0, window_bounds = array<i64: 1, 4, 128>}, {transform_indices = @transform_1, window_bounds = array<i64: 1, 4, 128>}, {pipeline_mode = #tpu.pipeline_mode<synchronous>, transform_indices = @transform_2, window_bounds = array<i64: 8, 16>}, {transform_indices = @transform_3, window_bounds = array<i64: 1, 8, 128>}]} {
    %c0 = arith.constant 0 : index
    %c0_0 = arith.constant 0 : index
    %c0_1 = arith.constant 0 : index
    %0 = vector.load %arg1[%c0, %c0_0, %c0_1] : memref<1x4x128xf32, #tpu.memory_space<vmem>>, vector<1x4x128xf32>
    %1 = vector.shape_cast %0 : vector<1x4x128xf32> to vector<4x128xf32>
    %cst = arith.constant 0.000000e+00 : f32
    %2 = vector.broadcast %cst : f32 to vector<4x128xf32>
    %3 = arith.maximumf %1, %2 : vector<4x128xf32>
    %c0_2 = arith.constant 0 : index
    %c0_3 = arith.constant 0 : index
    %c0_4 = arith.constant 0 : index
    %4 = vector.load %arg2[%c0_2, %c0_3, %c0_4] : memref<1x4x128xf32, #tpu.memory_space<vmem>>, vector<1x4x128xf32>
    %5 = vector.shape_cast %4 : vector<1x4x128xf32> to vector<4x128xf32>
    %cst_5 = arith.constant 0.000000e+00 : f32
    %6 = vector.broadcast %cst_5 : f32 to vector<4x128xf32>
    %7 = arith.maximumf %5, %6 : vector<4x128xf32>
    %8 = tpu.iota {dimensions = array<i32: 1>} : vector<4x128xi32>
    %c8_i32 = arith.constant 8 : i32
    %c0_i32 = arith.constant 0 : i32
    %9 = arith.cmpi eq, %c8_i32, %c0_i32 : i32
    %c1_i32 = arith.constant 1 : i32
    %10 = arith.select %9, %c1_i32, %c8_i32 : i32
    %11 = vector.broadcast %10 : i32 to vector<4x128xi32>
    %12 = arith.remsi %8, %11 : vector<4x128xi32>
    %c0_i32_6 = arith.constant 0 : i32
    %13 = vector.broadcast %c0_i32_6 : i32 to vector<4x128xi32>
    %14 = arith.cmpi ne, %12, %13 : vector<4x128xi32>
    %c0_i32_7 = arith.constant 0 : i32
    %15 = vector.broadcast %c0_i32_7 : i32 to vector<4x128xi32>
    %16 = arith.cmpi slt, %12, %15 : vector<4x128xi32>
    %c0_i32_8 = arith.constant 0 : i32
    %17 = arith.cmpi slt, %10, %c0_i32_8 : i32
    %18 = vector.broadcast %17 : i1 to vector<4x128xi1>
    %19 = vector.broadcast %18 : vector<4x128xi1> to vector<4x128xi1>
    %20 = arith.xori %16, %19 : vector<4x128xi1>
    %21 = arith.andi %20, %14 : vector<4x128xi1>
    %22 = vector.broadcast %10 : i32 to vector<4x128xi32>
    %23 = arith.addi %12, %22 : vector<4x128xi32>
    %24 = arith.select %21, %23, %12 : vector<4x128xi1>, vector<4x128xi32>
    %c0_i32_9 = arith.constant 0 : i32
    %25 = vector.broadcast %c0_i32_9 : i32 to vector<4x128xi32>
    %26 = arith.cmpi eq, %24, %25 : vector<4x128xi32>
    %c1_i32_10 = arith.constant 1 : i32
    %27 = tpu.dynamic_rotate %7 by %c1_i32_10 dim 1 : vector<4x128xf32>, i32 -> vector<4x128xf32>
    %cst_11 = arith.constant 0.000000e+00 : f32
    %28 = vector.broadcast %cst_11 : f32 to vector<4x128xf32>
    %29 = arith.select %26, %28, %27 : vector<4x128xi1>, vector<4x128xf32>
    %c7_i32 = arith.constant 7 : i32
    %30 = vector.broadcast %c7_i32 : i32 to vector<4x128xi32>
    %31 = arith.cmpi eq, %24, %30 : vector<4x128xi32>
    %c127_i32 = arith.constant 127 : i32
    %32 = tpu.dynamic_rotate %3 by %c127_i32 dim 1 : vector<4x128xf32>, i32 -> vector<4x128xf32>
    %cst_12 = arith.constant 0.000000e+00 : f32
    %33 = vector.broadcast %cst_12 : f32 to vector<4x128xf32>
    %34 = arith.select %31, %33, %32 : vector<4x128xi1>, vector<4x128xf32>
    %35 = tpu.concatenate %29, %3, %7, %34 in 0 : vector<4x128xf32>, vector<4x128xf32>, vector<4x128xf32>, vector<4x128xf32> -> vector<16x128xf32>
    %c0_13 = arith.constant 0 : index
    %c0_14 = arith.constant 0 : index
    %36 = vector.load %arg3[%c0_13, %c0_14] : memref<8x16xf32, #tpu.memory_space<vmem>>, vector<8x16xf32>
    %cst_15 = arith.constant dense<0.000000e+00> : vector<8x128xf32>
    %37 = tpu.matmul %36, %35, %cst_15 {dimension_numbers = #tpu.dot_dimension_numbers<[1], [0], [0], [1], [0, 0, 1, 1], [], []>} : vector<8x16xf32>, vector<16x128xf32>, vector<8x128xf32> -> vector<8x128xf32>
    %cst_16 = arith.constant dense<0.000000e+00> : vector<8xf32>
    %38 = vector.multi_reduction <add>, %37, %cst_16 [1] : vector<8x128xf32> to vector<8xf32>
    %39 = vector.shape_cast %38 : vector<8xf32> to vector<8x1xf32>
    %cst_17 = arith.constant 1.280000e+02 : f32
    %40 = vector.broadcast %cst_17 : f32 to vector<8x1xf32>
    %41 = arith.divf %39, %40 : vector<8x1xf32>
    %42 = vector.broadcast %41 : vector<8x1xf32> to vector<8x128xf32>
    %43 = arith.subf %37, %42 : vector<8x128xf32>
    %44 = arith.mulf %43, %43 : vector<8x128xf32>
    %cst_18 = arith.constant dense<0.000000e+00> : vector<8xf32>
    %45 = vector.multi_reduction <add>, %44, %cst_18 [1] : vector<8x128xf32> to vector<8xf32>
    %46 = vector.shape_cast %45 : vector<8xf32> to vector<8x1xf32>
    %cst_19 = arith.constant 1.280000e+02 : f32
    %47 = vector.broadcast %cst_19 : f32 to vector<8x1xf32>
    %48 = arith.divf %46, %47 : vector<8x1xf32>
    %cst_20 = arith.constant 9.99999974E-6 : f32
    %49 = vector.broadcast %cst_20 : f32 to vector<8x1xf32>
    %50 = arith.addf %48, %49 : vector<8x1xf32>
    %51 = math.rsqrt %50 : vector<8x1xf32>
    %52 = vector.broadcast %51 : vector<8x1xf32> to vector<8x128xf32>
    %53 = arith.mulf %43, %52 : vector<8x128xf32>
    %c0_21 = arith.constant 0 : index
    %c0_22 = arith.constant 0 : index
    %c0_23 = arith.constant 0 : index
    %54 = vector.load %arg4[%c0_21, %c0_22, %c0_23] : memref<1x8x128xf32, #tpu.memory_space<vmem>>, vector<1x8x128xf32>
    %55 = vector.shape_cast %54 : vector<1x8x128xf32> to vector<8x128xf32>
    %56 = vector.shape_cast %53 : vector<8x128xf32> to vector<1x8x128xf32>
    tpu.vector_store %arg4[%c0_21, %c0_22, %c0_23], %56 {strides = array<i32>} : memref<1x8x128xf32, #tpu.memory_space<vmem>>, vector<1x8x128xf32>,
    return
  }
  func.func @transform_0(%arg0: i32) -> (i32, i32, i32) {
    %c0_i32 = arith.constant 0 : i32
    %c0_i32_0 = arith.constant 0 : i32
    %c0_i32_1 = arith.constant 0 : i32
    return %arg0, %c0_i32, %c0_i32_0 : i32, i32, i32
  }
  func.func @transform_1(%arg0: i32) -> (i32, i32, i32) {
    %c0_i32 = arith.constant 0 : i32
    %c0_i32_0 = arith.constant 0 : i32
    %c0_i32_1 = arith.constant 0 : i32
    return %arg0, %c0_i32, %c0_i32_0 : i32, i32, i32
  }
  func.func @transform_2(%arg0: i32) -> (i32, i32) {
    %c0_i32 = arith.constant 0 : i32
    %c0_i32_0 = arith.constant 0 : i32
    %c0_i32_1 = arith.constant 0 : i32
    return %c0_i32, %c0_i32_0 : i32, i32
  }
  func.func @transform_3(%arg0: i32) -> (i32, i32, i32) {
    %c0_i32 = arith.constant 0 : i32
    %c0_i32_0 = arith.constant 0 : i32
    %c0_i32_1 = arith.constant 0 : i32
    return %arg0, %c0_i32, %c0_i32_0 : i32, i32, i32
  }
}

</mosaic_0001>

<bundles_post_ra>
// kernel: conv_1d_forward.1
= control target key start
LH: loop header
LB: loop body
LE: loop exit
PB: predicated region body
PF: predicated region fallthrough
CT: control target
= control target key end

     0   :  { %s443_s12 = smov 0   ;;  %s470_s0 = inlined_call_operand.vmem [shape: f32[2,4,128], index: 0, kind: input, shape index: {}]   ;;  %s471_s1 = inlined_call_operand.vmem [shape: f32[2,4,128], index: 1, kind: input, shape index: {}]   ;;  %s472_s2 = inlined_call_operand.vmem [shape: f32[8,16], index: 2, kind: input, shape index: {}]   ;;  %s473_s3 = inlined_call_operand.vmem [shape: f32[2,8,128], index: 3, kind: output, shape index: {}]  }
   0x1 LB: > { %s371_s13 = sadd.s32 4294967295, %s416_s12   ;;  %p375_p0 = scmp.ge.s32.totalorder %s416_s12, 1  ;;  %s416_s12 = sphi %s443_s12, %s13_s12  }
   0x2   : > { %p145_p1 = scmp.lt.s32.totalorder %s416_s12, 3 }
   0x4   : > { %p146_p2 = pnand %p375_p0, %p145_p1 }
   0x5   : > { %p171_p3 = scmp.lt.s32.totalorder (!%p146_p2), %s371_s13, 1  ;;  %v418_v0 = vmov (!%p146_p2), 0.0|0.0   ;;  %vm419_vm0 = vmmov (!%p146_p2), 0   ;;  %v420_v1 = vmov (!%p146_p2), 0.0   ;;  %s421_s21 = smov (!%p146_p2), 127   ;;  %v187_v6 = vlaneseq (!%p146_p2)  ;;  %v218_v18 = vld [vmem:[%s472_s2] sm:$0xff] (!%p146_p2) }
   0x6   : > { %149 = sbr.rel (%p146_p2) target bundleno = 665 (0x299), region = 32  ;;  %392 = vmatprep.subr.bf16.mxu0 (!%p146_p2), %v418_v0  ;;  %389 = vmatprep.mubr.msk.f32.mxu0 (!%p146_p2), %vm419_vm0, %v420_v1  ;;  %s422_s22 = smov (!%p146_p2), 1   ;;  %vm215_vm3 = vcmask (!%p146_p2), 1043456   ;;  %vm219_vm4 = vcmask (!%p146_p2), 130048  }
   0x7   : > { %v188_v7 = vand.u32 (!%p146_p2), 127, %v187_v6 }
   0x9   : > { %v193_v8 = vand.u32 (!%p146_p2), 7, %v188_v7 }
   0xb   : > { %vm205_vm1 = vcmp.eq.s32.totalorder (!%p146_p2), %v193_v8, 7  ;;  %vm201_vm2 = vcmp.eq.s32.totalorder (!%p146_p2), %v193_v8, 0 }
   0xd   : > { %s475_s13 = smov (!%p171_p3, %s371_s13), 1 }
   0xe   : > { %s376_s14 = sshll.u32 %s475_s13, 2  ;;  %s378_s25 = sshll.u32 %s475_s13, 3 }
   0xf   : > { %s174_s17 = scalar_lea.vmem %s470_s0, %s376_s14  ;;  %s178_s20 = scalar_lea.vmem %s471_s1, %s376_s14 }
  0x10   : > { %v183_v2 = vld [vmem:[%s174_s17] sm:$0xf]  ;;  %s182_s28 = scalar_lea.vmem %s473_s3, %s378_s25 }
  0x11   : > { %v185_v3 = vld [vmem:[%s178_s20] sm:$0xf]  ;;  %v184_v4 = vmax.f32 %v183_v2, 0.0 }
  0x12   : > { %v186_v5 = vmax.f32 %v185_v3, 0.0 }
  0x13   : > { %206 = vrot.lane.b32.xlu0 %v184_v4, %s421_s21  ;;  %v210_v11 = vrot.slane %v184_v4, 4 }
  0x17   : > { %202 = vrot.lane.b32.xlu0 %v186_v5, %s422_s22 }
  0x85   : > { %v207_v9 = vpop.permute.xlu0 %206 }
  0x86   : > { %v208_v10 = vsel %vm205_vm1, 0.0, %v207_v9 }
  0x87   : > { %v213_v12 = vrot.slane %v208_v10, 4 }
  0x89   : > { %v203_v13 = vpop.permute.xlu0 %202  ;;  %v217_v16 = vsel %vm215_vm3, %v186_v5, %v213_v12 }
  0x8a   : > { %v204_v14 = vsel %vm201_vm2, 0.0, %v203_v13 }
  0x8b   : > { %v216_v15 = vsel %vm215_vm3, %v204_v14, %v210_v11 }
  0x8c   : > { %v393_v17 = vpack.c.bf16 %v217_v16, %v216_v15 }
  0x8e   : > { %394 = vmatpush3.bf16.msra.mxu0 %v393_v17 }
  0x91   : > { %390 = vmatmul.mubr.msk.f32.vlgmr.msra.gmra.mrb[0].mxu0 %vm219_vm4, %v218_v18 }
 0x164   : > { %v289_v19 = vpop.f32.mrb[0].mxu0 }
 0x165   : > { %293 = vadd.xlane.f32.xlu1 %v289_v19  ;;  %v391_v20 = vpop.f32.mrb[1].mxu0 }
 0x1f2   : > { %v294_v21 = vpop.xlane.xlu1 %293 }
 0x1f3   : > { %v296_v22 = vmul.f32 0.0078125, %v294_v21 }
 0x1f5   : > { %v297_v23 = vsub.f32 %v289_v19, %v296_v22 }
 0x1f7   : > { %v298_v24 = vmul.f32 %v297_v23, %v297_v23 }
 0x1f9   : > { %299 = vadd.xlane.f32.xlu1 %v298_v24 }
 0x286   : > { %v300_v25 = vpop.xlane.xlu1 %299 }
 0x287   : > { %v301_v26 = vmul.f32 0.0078125, %v300_v25 }
 0x289   : > { %v302_v27 = vadd.f32 1e-05, %v301_v26 }
 0x28b   : > { %408 = vrsqrt.f32 %v302_v27 }
 0x295   : > { %v409_v28 = vpop.eup %408 }
 0x296   : > { %v304_v29 = vmul.f32 %v409_v28, %v297_v23 }
 0x298   : > { %305 = vst [vmem:[%s182_s28] sm:$0xff] %v304_v29 }
 0x299 PF: > { %s13_s12 = sadd.s32 1, %s416_s12  }
 0x29a   : > { %p10_p4 = scmp.ge.s32.totalorder %s13_s12, 4  }
 0x29c   :  { %12 = sbr.rel (!%p10_p4) target bundleno = 1 (0x1), region = 65 }

</bundles_post_ra>
